<compile_context>
chip_gen: v7x
topology: tpu7x:2x2x1
jax: 0.10.0
libtpu: 0.0.40
codegen_flags: <defaults>
</compile_context>

<pallas_src>
import jax
import jax.numpy as jnp
from jax import lax
from jax.experimental import pallas as pl
from jax.experimental.pallas import tpu as pltpu


def _head_kernel(x_ref, w_ref, b_ref, o_ref, acc_ref):
    # x_ref: (tb, tk)   -- S axis squeezed, slice 0 selected by the index_map
    # w_ref: (to, tk)   -- nn.Linear layout, contracted on its last dim (no transpose copy)
    # b_ref: (1,  to)
    # o_ref: (tb, to)
    # acc_ref: (tb, to) f32 VMEM accumulator, resident across the K axis
    k = pl.program_id(2)

    @pl.when(k == 0)
    def _():
        acc_ref[...] = jnp.zeros_like(acc_ref)

    acc_ref[...] += lax.dot_general(
        x_ref[...],
        w_ref[...],
        dimension_numbers=(((1,), (1,)), ((), ())),  # contract D with D (implicit trans_b)
        preferred_element_type=jnp.float32,
    )

    @pl.when(k == pl.num_programs(2) - 1)
    def _():
        # Single f32 epilogue: bias add + cast (keeps bf16 elementwise off v5e's VPU).
        o_ref[...] = (acc_ref[...] + b_ref[...].astype(jnp.float32)).astype(o_ref.dtype)


def _pick_tile(dim: int, max_tile: int, granule: int) -> int:
    """Largest tile <= max_tile that divides `dim` and is a multiple of `granule`,
    or the full dim when it is small / has no such divisor (full-extent blocks are legal)."""
    if dim <= max_tile:
        return dim
    t = (max_tile // granule) * granule
    while t >= granule:
        if dim % t == 0:
            return t
        t -= granule
    return dim


def at_regression_head(x, weight, bias, *, max_tb=256, max_to=1024, max_tk=512):
    """x: (S, B, D); weight: (O, D); bias: (O,). Returns (B, O) = x[0] @ weight.T + bias."""
    S, B, D = x.shape
    O, D_w = weight.shape
    assert D_w == D and bias.shape == (O,)

    # Lane-dense output: pad the head dim O to a multiple of 128 (zero rows in W, zeros in b)
    # so the output writeback is unmasked full-lane stores; the pad is sliced off below.
    O_pad = ((O + 127) // 128) * 128
    if O_pad != O:
        weight = jnp.pad(weight, ((0, O_pad - O), (0, 0)))
        bias = jnp.pad(bias, (0, O_pad - O))
    b2d = bias.reshape(1, O_pad)

    # Tile sizes: budgeted conservatively so large D/O also fit v7x's 64 MiB VMEM
    # (with double-buffering) while collapsing to a single block at small shapes.
    tb = _pick_tile(B, max_tb, 8)
    to = _pick_tile(O_pad, max_to, 128)
    tk = _pick_tile(D, max_tk, 128)
    grid = (B // tb, O_pad // to, D // tk)

    itemsize = jnp.dtype(x.dtype).itemsize
    cost = pl.CostEstimate(
        flops=2 * B * D * O_pad,
        transcendentals=0,
        bytes_accessed=(B * D + O_pad * D + O_pad + B * O_pad) * itemsize,
    )

    out = pl.pallas_call(
        _head_kernel,
        out_shape=jax.ShapeDtypeStruct((B, O_pad), x.dtype),
        grid=grid,
        in_specs=[
            # Full (S, B, D) array passed in; only the S=0 slice is DMA'd HBM->VMEM.
            pl.BlockSpec((pl.Squeezed(), tb, tk), lambda i, j, k: (0, i, k)),
            pl.BlockSpec((to, tk), lambda i, j, k: (j, k)),
            pl.BlockSpec((1, to), lambda i, j, k: (0, j)),
        ],
        out_specs=pl.BlockSpec((tb, to), lambda i, j, k: (i, j)),
        scratch_shapes=[pltpu.VMEM((tb, to), jnp.float32)],
        compiler_params=pltpu.CompilerParams(
            dimension_semantics=("parallel", "parallel", "arbitrary"),
        ),
        cost_estimate=cost,
    )(x, weight, b2d)

    return out[:, :O] if O_pad != O else out


if __name__ == "__main__":
    # Small shapes consistent with the module: seq=4, batch=8, input_dim=32, output_dim=16
    seq, batch, input_dim, output_dim = 4, 8, 32, 16

    key = jax.random.PRNGKey(0)
    kx, kw, kb = jax.random.split(key, 3)

    x = jax.random.normal(kx, (seq, batch, input_dim), dtype=jnp.float32)
    # Deterministic synthetic parameters matching nn.Linear shapes.
    weight = jax.random.normal(kw, (output_dim, input_dim), dtype=jnp.float32) * 0.05
    bias = jax.random.normal(kb, (output_dim,), dtype=jnp.float32) * 0.05
    # TODO(synk): layer_norm params (gamma/beta over input_dim) exist in __init__ but are
    # unused in forward, so they are intentionally not materialized or applied here.

    y = at_regression_head(x, weight, bias)
    jax.block_until_ready(y)

    # Reference check in plain JAX.
    y_ref = x[0] @ weight.T + bias
    assert y.shape == (batch, output_dim)
    assert jnp.allclose(y, y_ref, atol=1e-5, rtol=1e-5)

    print("KERNEL_OK")
</pallas_src>

<mosaic_0001>
module attributes {stable_mosaic.version = 11 : i64} {
  func.func @_head_kernel(%arg0: i32, %arg1: i32, %arg2: i32, %arg3: memref<1x8x32xf32, #tpu.memory_space<vmem>>, %arg4: memref<128x32xf32, #tpu.memory_space<vmem>>, %arg5: memref<1x128xf32, #tpu.memory_space<vmem>>, %arg6: memref<8x128xf32, #tpu.memory_space<vmem>>, %arg7: memref<8x128xf32, #tpu.memory_space<vmem>>) attributes {dimension_semantics = [#tpu.dimension_semantics<parallel>, #tpu.dimension_semantics<parallel>, #tpu.dimension_semantics<arbitrary>], iteration_bounds = array<i64: 1, 1, 1>, scalar_prefetch = 0 : i64, scratch_operands = 1 : i64, tpu.core_type = #tpu.core_type<tc>, window_params = [{transform_indices = @transform_0, window_bounds = array<i64: 1, 8, 32>}, {transform_indices = @transform_1, window_bounds = array<i64: 128, 32>}, {transform_indices = @transform_2, window_bounds = array<i64: 1, 128>}, {transform_indices = @transform_3, window_bounds = array<i64: 8, 128>}]} {
    %c0_i32 = arith.constant 0 : i32
    %0 = arith.cmpi eq, %arg2, %c0_i32 : i32
    %1 = arith.extui %0 : i1 to i32
    %c0_i32_0 = arith.constant 0 : i32
    %2 = arith.cmpi ne, %1, %c0_i32_0 : i32
    scf.if %2 {
      %cst_11 = arith.constant 0.000000e+00 : f32
      %13 = vector.broadcast %cst_11 : f32 to vector<8x128xf32>
      %c0_12 = arith.constant 0 : index
      %c0_13 = arith.constant 0 : index
      %14 = vector.load %arg7[%c0_12, %c0_13] : memref<8x128xf32, #tpu.memory_space<vmem>>, vector<8x128xf32>
      tpu.vector_store %arg7[%c0_12, %c0_13], %13 {strides = array<i32>} : memref<8x128xf32, #tpu.memory_space<vmem>>, vector<8x128xf32>,
    } else {
    }
    %c0 = arith.constant 0 : index
    %c0_1 = arith.constant 0 : index
    %3 = vector.load %arg7[%c0, %c0_1] : memref<8x128xf32, #tpu.memory_space<vmem>>, vector<8x128xf32>
    %c0_2 = arith.constant 0 : index
    %c0_3 = arith.constant 0 : index
    %c0_4 = arith.constant 0 : index
    %4 = vector.load %arg3[%c0_2, %c0_3, %c0_4] : memref<1x8x32xf32, #tpu.memory_space<vmem>>, vector<1x8x32xf32>
    %5 = vector.shape_cast %4 : vector<1x8x32xf32> to vector<8x32xf32>
    %c0_5 = arith.constant 0 : index
    %c0_6 = arith.constant 0 : index
    %6 = vector.load %arg4[%c0_5, %c0_6] : memref<128x32xf32, #tpu.memory_space<vmem>>, vector<128x32xf32>
    %cst = arith.constant dense<0.000000e+00> : vector<8x128xf32>
    %7 = tpu.matmul %5, %6, %cst {dimension_numbers = #tpu.dot_dimension_numbers<[1], [1], [0], [0], [0, 0, 1, 0], [], []>} : vector<8x32xf32>, vector<128x32xf32>, vector<8x128xf32> -> vector<8x128xf32>
    %8 = arith.addf %3, %7 : vector<8x128xf32>
    %c0_7 = arith.constant 0 : index
    %c0_8 = arith.constant 0 : index
    %9 = vector.load %arg7[%c0_7, %c0_8] : memref<8x128xf32, #tpu.memory_space<vmem>>, vector<8x128xf32>
    tpu.vector_store %arg7[%c0_7, %c0_8], %8 {strides = array<i32>} : memref<8x128xf32, #tpu.memory_space<vmem>>, vector<8x128xf32>,
    %c0_i32_9 = arith.constant 0 : i32
    %10 = arith.cmpi eq, %arg2, %c0_i32_9 : i32
    %11 = arith.extui %10 : i1 to i32
    %c0_i32_10 = arith.constant 0 : i32
    %12 = arith.cmpi ne, %11, %c0_i32_10 : i32
    scf.if %12 {
      %c0_11 = arith.constant 0 : index
      %c0_12 = arith.constant 0 : index
      %13 = vector.load %arg7[%c0_11, %c0_12] : memref<8x128xf32, #tpu.memory_space<vmem>>, vector<8x128xf32>
      %c0_13 = arith.constant 0 : index
      %c0_14 = arith.constant 0 : index
      %14 = vector.load %arg5[%c0_13, %c0_14] : memref<1x128xf32, #tpu.memory_space<vmem>>, vector<1x128xf32>
      %15 = vector.broadcast %14 : vector<1x128xf32> to vector<8x128xf32>
      %16 = arith.addf %13, %15 : vector<8x128xf32>
      %c0_15 = arith.constant 0 : index
      %c0_16 = arith.constant 0 : index
      %17 = vector.load %arg6[%c0_15, %c0_16] : memref<8x128xf32, #tpu.memory_space<vmem>>, vector<8x128xf32>
      tpu.vector_store %arg6[%c0_15, %c0_16], %16 {strides = array<i32>} : memref<8x128xf32, #tpu.memory_space<vmem>>, vector<8x128xf32>,
    } else {
    }
    return
  }
  func.func @transform_0(%arg0: i32, %arg1: i32, %arg2: i32) -> (i32, i32, i32) {
    %c0_i32 = arith.constant 0 : i32
    %c0_i32_0 = arith.constant 0 : i32
    return %c0_i32, %arg0, %arg2 : i32, i32, i32
  }
  func.func @transform_1(%arg0: i32, %arg1: i32, %arg2: i32) -> (i32, i32) {
    %c0_i32 = arith.constant 0 : i32
    return %arg1, %arg2 : i32, i32
  }
  func.func @transform_2(%arg0: i32, %arg1: i32, %arg2: i32) -> (i32, i32) {
    %c0_i32 = arith.constant 0 : i32
    %c0_i32_0 = arith.constant 0 : i32
    return %c0_i32, %arg1 : i32, i32
  }
  func.func @transform_3(%arg0: i32, %arg1: i32, %arg2: i32) -> (i32, i32) {
    %c0_i32 = arith.constant 0 : i32
    return %arg0, %arg1 : i32, i32
  }
}

</mosaic_0001>

<bundles_post_ra>
// kernel: tpu_custom_call.1
= control target key start
LH: loop header
LB: loop body
LE: loop exit
PB: predicated region body
PF: predicated region fallthrough
CT: control target
= control target key end

     0   :  { %vm38_vm0 = vcmask 261120   ;;  %v319_v2 = vmov 0.0|0.0   ;;  %vm320_vm2 = vmmov 0   ;;  %v321_v5 = vmov 0.0   ;;  %s432_s0 = inlined_call_operand.vmem [shape: f32[4,8,32], index: 0, kind: input, shape index: {}]   ;;  %s433_s1 = inlined_call_operand.vmem [shape: f32[128,32], index: 1, kind: input, shape index: {}]   ;;  %s434_s2 = inlined_call_operand.vmem [shape: f32[1,128], index: 2, kind: input, shape index: {}]   ;;  %s435_s3 = inlined_call_operand.hbm [shape: f32[8,128], index: 3, kind: output, shape index: {}]  }
   0x1   :  { %v22_v0 = vld [vmem:[%s433_s1] sm:$0xff]  ;;  %v23_v1 = vld [vmem:[%s433_s1 + $0x8] sm:$0xff]  ;;  %259 = vmatprep.subr.bf16.mxu0 %v319_v2  ;;  %vm351_vm1 = vmpackc.low %vm38_vm0, %vm38_vm0  ;;  %256 = vmatprep.mubr.msk.f32.mxu0 %vm320_vm2, %v321_v5 }
   0x2   :  { %v260_v3 = vpack.c.bf16 %v23_v1, %v22_v0  ;;  %v24_v6 = vld [vmem:[%s433_s1 + $0x10] sm:$0xff]  ;;  %v25_v7 = vld [vmem:[%s433_s1 + $0x18] sm:$0xff] }
   0x4   :  { %262 = vmatpush3.bf16.xpose.msk.msra.mxu0 %vm351_vm1, %v260_v3 }
   0x5   :  { %263 = vmatprep.subr.bf16.mxu0 %v319_v2 }
   0x6   :  { %8 = vsyncpa [#allocation4], 0  ;;  %v264_v8 = vpack.c.bf16 %v25_v7, %v24_v6  ;;  %v26_v9 = vld [vmem:[%s433_s1 + $0x20] sm:$0xff]  ;;  %v27_v10 = vld [vmem:[%s433_s1 + $0x28] sm:$0xff]  ;;  %s322_s21 = smov [#allocation3]  }
   0x7   :  { %v268_v11 = vpack.c.bf16 %v27_v10, %v26_v9  ;;  %v28_v12 = vld [vmem:[%s433_s1 + $0x30] sm:$0xff]  ;;  %v29_v13 = vld [vmem:[%s433_s1 + $0x38] sm:$0xff]  ;;  %v30_v15 = vld [vmem:[%s433_s1 + $0x40] sm:$0xff]  ;;  %s181_s22 = sshll.u32 %s322_s21, 4  ;;  %s182_s22 = int_to_ptr.vmem [resolvable:$true] %s181_s22 }
   0x8   :  { %v272_v14 = vpack.c.bf16 %v29_v13, %v28_v12  ;;  %v31_v16 = vld [vmem:[%s433_s1 + $0x48] sm:$0xff]  ;;  %v32_v18 = vld [vmem:[%s433_s1 + $0x50] sm:$0xff]  ;;  %v33_v19 = vld [vmem:[%s433_s1 + $0x58] sm:$0xff]  ;;  %p300_p1 = scmp.lt.s32.totalorder %s182_s22, %s182_s22 }
   0x9   :  { %v276_v17 = vpack.c.bf16 %v31_v16, %v30_v15  ;;  %v280_v20 = vpack.c.bf16 %v33_v19, %v32_v18  ;;  %v34_v21 = vld [vmem:[%s433_s1 + $0x60] sm:$0xff]  ;;  %v35_v22 = vld [vmem:[%s433_s1 + $0x68] sm:$0xff]  ;;  %v36_v24 = vld [vmem:[%s433_s1 + $0x70] sm:$0xff] }
   0xa   :  { %v284_v23 = vpack.c.bf16 %v35_v22, %v34_v21  ;;  %v37_v25 = vld [vmem:[%s433_s1 + $0x78] sm:$0xff]  ;;  %v21_v27 = vld [vmem:[%s432_s0] sm:$0xff]  ;;  %s295_s1 = scalar_lea.vmem %s182_s22, 128 }
   0xb   :  { %v288_v26 = vpack.c.bf16 %v37_v25, %v36_v24  ;;  %v206_v28 = vld [vmem:[%s434_s2] ss:$0 sm:$0xff]  ;;  %p296_p0 = scmp.ne.s32.totalorder %s182_s22, %s295_s1  ;;  %p301_p2 = scmp.lt.s32.totalorder %s295_s1, %s295_s1 }
   0xc   :  { %266 = vmatpush3.bf16.xpose.msk.msra.mxu0 %vm351_vm1, %v264_v8 }
   0xd   :  { %267 = vmatprep.subr.bf16.mxu0 %v319_v2  ;;  %p302_p3 = por %p301_p2, %p300_p1 }
   0xf   :  { %p303_p4 = pnand %p302_p3, %p296_p0 }
  0x14   :  { %270 = vmatpush3.bf16.xpose.msk.msra.mxu0 %vm351_vm1, %v268_v11 }
  0x15   :  { %271 = vmatprep.subr.bf16.mxu0 %v319_v2 }
  0x1c   :  { %274 = vmatpush3.bf16.xpose.msk.msra.mxu0 %vm351_vm1, %v272_v14 }
  0x1d   :  { %275 = vmatprep.subr.bf16.mxu0 %v319_v2 }
  0x24   :  { %278 = vmatpush3.bf16.xpose.msk.msra.mxu0 %vm351_vm1, %v276_v17 }
  0x25   :  { %279 = vmatprep.subr.bf16.mxu0 %v319_v2 }
  0x2c   :  { %282 = vmatpush3.bf16.xpose.msk.msra.mxu0 %vm351_vm1, %v280_v20 }
  0x2d   :  { %283 = vmatprep.subr.bf16.mxu0 %v319_v2 }
  0x34   :  { %286 = vmatpush3.bf16.xpose.msk.msra.mxu0 %vm351_vm1, %v284_v23 }
  0x35   :  { %287 = vmatprep.subr.bf16.mxu0 %v319_v2 }
  0x3c   :  { %290 = vmatpush3.bf16.xpose.msk.msra.mxu0 %vm351_vm1, %v288_v26 }
  0x43   :  { %257 = vmatmul.mubr.msk.f32.vlgmr.msra.gmra.mrb[0].mxu0 %vm38_vm0, %v21_v27 }
 0x116   :  { %v156_v29 = vpop.f32.mrb[0].mxu0 }
 0x117   :  { %v173_v30 = vadd.f32 %v206_v28, %v156_v29  ;;  %v258_v31 = vpop.f32.mrb[1].mxu0 }
 0x119   :  { %174 = vst [vmem:[#allocation3] sm:$0xff] %v173_v30 }
 0x11a   :  { %306 = shalt.err (!%p303_p4)
}
 0x11b   :  { %s307_s24 = scalar_lea.hbm %s435_s3, 128 }
 0x11c   :  { %p308_p5 = scmp.ne.s32.totalorder %s435_s3, %s307_s24  ;;  %p311_p6 = scmp.lt.u32.totalorder %s307_s24, %s435_s3 }
 0x11e   :  { %p313_p7 = pnand %p311_p6, %p308_p5 }
 0x120   :  { %316 = shalt.err (!%p313_p7)
}
 0x121   :  { %184 = dma.vmem_to_hbm [thread:$0]  %s182_s22, 128, %s435_s3, [#allocation4]  }
 0x122   :  { %317 = dma.done.wait [#allocation4], 128  }
 0x123   :  { %318 = vsyncadd [#allocation4], 4294967168 }
 0x124   :  { %188 = vsyncpa [#allocation4], 1 }

</bundles_post_ra>
